<compile_context>
chip_gen: v5e
topology: v5e:2x2
jax: 0.10.0
libtpu: 0.0.40
codegen_flags: <defaults>
</compile_context>

<pallas_src>
import numpy as np
import jax
import jax.numpy as jnp
from jax.experimental import pallas as pl
from jax.experimental.pallas import tpu as pltpu

LEAKY_SLOPE = 0.01      # torch.nn.LeakyReLU default negative_slope
_PAD_TOP = 8            # sublane-aligned row offset of the padded window
                        # inside the stage-2 VMEM scratch


def _cdiv(a, b):
    return -(-a // b)


def _round_up(a, m):
    return _cdiv(a, m) * m


# --------------------------------------------------------------------------- #
# Kernel
# --------------------------------------------------------------------------- #
def _block_kernel(x_ref, w1_ref, b1_ref, w2_ref, b2_ref, o_ref, xp2_ref):
    """Fused (conv3x3 + LeakyReLU) x 2 for one tile of Bt images.

    x_ref  : (Mw, N0)        bf16  row window: [zero] ++ Bt y-padded images ++ [zero]
    w1_ref : (3, N0,  N1p)   bf16  banded conv1 weights (x-pad folded in)
    b1_ref : (1, N1p)        f32   conv1 bias tiled across W (lane = x*Cmid + c)
    w2_ref : (3, N1p, N2p)   bf16  banded conv2 weights
    b2_ref : (1, N2p)        f32
    o_ref  : (Bt, H, N2p)          per-image interior rows (lane-dense stores)
    xp2_ref: VMEM (M+16,N1p) bf16  row-padded intermediate (never touches HBM)
    """
    Mw, _ = x_ref.shape
    M = Mw - 2                       # Bt * (H + 2) padded rows per tile
    Bt, H, N2p = o_ref.shape
    P = M // Bt                      # H + 2
    N1p = xp2_ref.shape[1]
    cdt = xp2_ref.dtype
    zrow2 = jnp.zeros((2, N1p), cdt)

    def leaky(a):
        return jnp.where(a >= 0, a, LEAKY_SLOPE * a)

    # ---- stage 1: conv1 as 3 row-slab matmuls (bf16 x bf16 -> f32 acc) ------
    acc = jnp.zeros((M, N1p), jnp.float32)
    for ky in range(3):
        acc = acc + jnp.dot(x_ref[ky:ky + M, :], w1_ref[ky],
                            preferred_element_type=jnp.float32)
    h = leaky(acc + b1_ref[...]).astype(cdt)                    # (M, N1p)

    # ---- stage 2 input: VMEM-resident, row-padded intermediate --------------
    # Interior rows are fully overwritten every step; only the halo slivers
    # are zeroed (no full-buffer memset).  _PAD_TOP keeps the big store
    # sublane-aligned.
    xp2_ref[_PAD_TOP:_PAD_TOP + M, :] = h
    xp2_ref[_PAD_TOP - 1:_PAD_TOP + 1, :] = zrow2               # window top + image-0 top halo
    for b in range(Bt - 1):
        r = _PAD_TOP + (b + 1) * P - 1                          # img-b bottom / img-(b+1) top halo
        xp2_ref[r:r + 2, :] = zrow2
    xp2_ref[_PAD_TOP + M - 1:_PAD_TOP + M + 1, :] = zrow2       # last bottom halo + window bottom

    # ---- stage 2: conv2 + bias + LeakyReLU -----------------------------------
    acc2 = jnp.zeros((M, N2p), jnp.float32)
    for ky in range(3):
        s = _PAD_TOP - 1 + ky
        acc2 = acc2 + jnp.dot(xp2_ref[s:s + M, :], w2_ref[ky],
                              preferred_element_type=jnp.float32)
    y = leaky(acc2 + b2_ref[...]).astype(o_ref.dtype)           # (M, N2p)

    # ---- scatter the interior rows of each image (lane-dense output stores) -
    for b in range(Bt):
        o_ref[b, :, :] = y[b * P + 1:b * P + 1 + H, :]


# --------------------------------------------------------------------------- #
# Hoisted parameter preparation
# --------------------------------------------------------------------------- #
def _banded_conv_weight(w_oihw, width, k_pad, n_pad, dtype):
    """Expand a 3x3 OIHW conv weight into per-ky banded matrices (3, k_pad, n_pad).

    band[ky, xi*Cin + ci, xo*Cout + co] = w[co, ci, ky, xi - xo + 1] if |xi-xo|<=1
                                          else 0
    The x-direction zero padding of the conv is folded into the band, so the
    kernel needs no lane padding at all.
    """
    c_out, c_in, kh, kw = w_oihw.shape
    w_hwio = jnp.transpose(w_oihw, (2, 3, 1, 0))                # (kh, kw, Ci, Co)
    xi = jnp.arange(width)[:, None]                             # input column
    xo = jnp.arange(width)[None, :]                             # output column
    kx = xi - xo + 1                                            # (W, W)
    valid = (kx >= 0) & (kx < kw)
    kxc = jnp.clip(kx, 0, kw - 1)
    sel = w_hwio[:, kxc, :, :]                                  # (kh, W, W, Ci, Co)
    sel = sel * valid[None, :, :, None, None].astype(sel.dtype)
    band = jnp.transpose(sel, (0, 1, 3, 2, 4))                  # (kh, xi, Ci, xo, Co)
    band = band.reshape(kh, width * c_in, width * c_out)
    band = jnp.pad(band, ((0, 0),
                          (0, k_pad - width * c_in),
                          (0, n_pad - width * c_out)))
    return band.astype(dtype)


def prepare_block_params(params, width, compute_dtype=jnp.bfloat16):
    """One-time (hoisted) conversion of PyTorch OIHW params to kernel layout."""
    cmid, cin = params["w1"].shape[:2]
    cout = params["w2"].shape[0]
    n0 = width * cin
    n1p = _round_up(width * cmid, 128)
    n2p = _round_up(width * cout, 128)

    def tiled_bias(b, n_pad):
        bt = jnp.tile(b.astype(jnp.float32), width)             # lane = x*C + c
        return jnp.pad(bt, (0, n_pad - bt.shape[0])).reshape(1, n_pad)

    return {
        "w1": _banded_conv_weight(params["w1"], width, n0, n1p, compute_dtype),
        "b1": tiled_bias(params["b1"], n1p),
        "w2": _banded_conv_weight(params["w2"], width, n1p, n2p, compute_dtype),
        "b2": tiled_bias(params["b2"], n2p),
    }


# --------------------------------------------------------------------------- #
# Forward wrappers
# --------------------------------------------------------------------------- #
def block_forward_nhwc(x_nhwc, prep, out_channels, *, batch_tile=None):
    """Fused Block forward on NHWC input (native layout; no transposes)."""
    B, H, W, Cin = x_nhwc.shape
    N0 = W * Cin
    assert prep["w1"].shape[1] == N0, "prep was built for a different W / Cin"
    N1p = prep["w1"].shape[2]
    N2p = prep["w2"].shape[2]
    N2 = W * out_channels
    assert N2 <= N2p
    compute_dtype = prep["w1"].dtype
    out_dtype = x_nhwc.dtype

    # Batch tiling: M = Bt*(H+2) ~ 128 MXU rows per grid step, but keep >= 2
    # grid steps whenever B >= 2 so both v7x TensorCores get work.
    P = H + 2
    if batch_tile is None:
        bt_mxu = max(1, 128 // P)
        T = max(2 if B >= 2 else 1, _cdiv(B, bt_mxu))
    else:
        T = _cdiv(B, max(1, batch_tile))
    Bt = _cdiv(B, T)
    T = _cdiv(B, Bt)
    Bp = T * Bt
    M = Bt * P
    Mw = M + 2

    # Per-tile padded row window, built once in HBM (one cheap pad pass):
    #   [zero row] ++ concat_b([zero] ++ image-b rows ++ [zero]) ++ [zero row]
    x_rows = x_nhwc.reshape(B, H, N0)
    if Bp != B:
        x_rows = jnp.pad(x_rows, ((0, Bp - B), (0, 0), (0, 0)))
    x_rows = jnp.pad(x_rows, ((0, 0), (1, 1), (0, 0)))           # per-image y halos
    x_win = jnp.pad(x_rows.reshape(T, M, N0), ((0, 0), (1, 1), (0, 0)))
    x_win = x_win.astype(compute_dtype)

    # Explicit VMEM budget: double-buffered in/out blocks + weights + scratch.
    isz = lambda dt: np.dtype(dt).itemsize
    est = (2 * Mw * N0 * isz(compute_dtype)
           + 2 * Bt * H * N2p * isz(out_dtype)
           + 2 * sum(int(np.prod(prep[k].shape)) * prep[k].dtype.itemsize
                     for k in ("w1", "b1", "w2", "b2"))
           + (M + 16) * N1p * isz(compute_dtype))
    vmem_limit = int(min(max(2 * est, 32 * 1024 * 1024), 64 * 1024 * 1024))

    out_padded = pl.pallas_call(
        _block_kernel,
        out_shape=jax.ShapeDtypeStruct((Bp, H, N2p), out_dtype),
        grid=(T,),
        in_specs=[
            pl.BlockSpec((None, Mw, N0), lambda t: (t, 0, 0)),
            pl.BlockSpec(prep["w1"].shape, lambda t: (0, 0, 0)),
            pl.BlockSpec(prep["b1"].shape, lambda t: (0, 0)),
            pl.BlockSpec(prep["w2"].shape, lambda t: (0, 0, 0)),
            pl.BlockSpec(prep["b2"].shape, lambda t: (0, 0)),
        ],
        out_specs=pl.BlockSpec((Bt, H, N2p), lambda t: (t, 0, 0)),
        scratch_shapes=[pltpu.VMEM((M + 16, N1p), compute_dtype)],
        compiler_params=pltpu.CompilerParams(
            dimension_semantics=("parallel",),
            vmem_limit_bytes=vmem_limit,
        ),
    )(x_win, prep["w1"], prep["b1"], prep["w2"], prep["b2"])

    return out_padded[:B, :, :N2].reshape(B, H, W, out_channels)


def block_forward(x_nchw, prep, out_channels):
    """PyTorch-parity wrapper: NCHW in / NCHW out.

    The NCHW<->NHWC transposes exist only for parity with the PyTorch module;
    in an end-to-end NHWC network, call block_forward_nhwc directly and keep
    activations in row layout (the transposes are full HBM passes).
    """
    x = jnp.transpose(x_nchw, (0, 2, 3, 1))
    y = block_forward_nhwc(x, prep, out_channels)
    return jnp.transpose(y, (0, 3, 1, 2))


# --------------------------------------------------------------------------- #
# Parameters / reference
# --------------------------------------------------------------------------- #
def init_block_params(key, in_channels, middle_channels, out_channels,
                      dtype=jnp.float32):
    """Deterministic synthetic parameters (PyTorch Conv2d weight layout OIHW)."""
    k1, k2, k3, k4 = jax.random.split(key, 4)

    def uinit(k, shape, fan_in):
        bound = 1.0 / jnp.sqrt(fan_in)
        return jax.random.uniform(k, shape, dtype, minval=-bound, maxval=bound)

    w1 = uinit(k1, (middle_channels, in_channels, 3, 3), in_channels * 9)
    b1 = uinit(k2, (middle_channels,), in_channels * 9)
    w2 = uinit(k3, (out_channels, middle_channels, 3, 3), middle_channels * 9)
    b2 = uinit(k4, (out_channels,), middle_channels * 9)
    return {"w1": w1, "b1": b1, "w2": w2, "b2": b2}


def _reference_forward(x_nchw, params, compute_dtype=jnp.bfloat16):
    """Pure-JAX reference with the same operand-dtype policy as the kernel."""
    def conv_lrelu(x, w, b):
        y = jax.lax.conv_general_dilated(
            x.astype(compute_dtype), w.astype(compute_dtype),
            window_strides=(1, 1), padding=((1, 1), (1, 1)),
            dimension_numbers=("NCHW", "OIHW", "NCHW"),
            preferred_element_type=jnp.float32)
        y = y + b.astype(jnp.float32)[None, :, None, None]
        return jnp.where(y >= 0, y, LEAKY_SLOPE * y)

    h = conv_lrelu(x_nchw, params["w1"], params["b1"])
    return conv_lrelu(h, params["w2"], params["b2"]).astype(x_nchw.dtype)


if __name__ == "__main__":
    key = jax.random.PRNGKey(0)
    kx, kp = jax.random.split(key)

    B, Cin, Cmid, Cout, H, W = 2, 4, 8, 4, 16, 16
    x = jax.random.normal(kx, (B, Cin, H, W), dtype=jnp.float32)
    params = init_block_params(kp, Cin, Cmid, Cout)

    # Hoisted one-time parameter prep (banded bf16 MXU weights, tiled biases).
    prep = prepare_block_params(params, W, compute_dtype=jnp.bfloat16)

    fwd = jax.jit(block_forward, static_argnums=(2,))
    out = jax.block_until_ready(fwd(x, prep, Cout))

    ref = _reference_forward(x, params, compute_dtype=jnp.bfloat16)
    assert out.shape == (B, Cout, H, W)
    max_err = float(jnp.max(jnp.abs(out - ref)))
    assert jnp.allclose(out, ref, rtol=2e-2, atol=2e-2), (
        f"mismatch vs reference, max abs err = {max_err}")
    print("KERNEL_OK")
</pallas_src>

<mosaic_0001>
module attributes {stable_mosaic.version = 11 : i64} {
  func.func @_block_kernel(%arg0: i32, %arg1: memref<1x20x64xbf16, #tpu.memory_space<vmem>>, %arg2: memref<3x64x128xbf16, #tpu.memory_space<vmem>>, %arg3: memref<1x128xf32, #tpu.memory_space<vmem>>, %arg4: memref<3x128x128xbf16, #tpu.memory_space<vmem>>, %arg5: memref<1x128xf32, #tpu.memory_space<vmem>>, %arg6: memref<1x16x128xf32, #tpu.memory_space<vmem>>, %arg7: memref<34x128xbf16, #tpu.memory_space<vmem>>) attributes {dimension_semantics = [#tpu.dimension_semantics<parallel>], iteration_bounds = array<i64: 2>, scalar_prefetch = 0 : i64, scratch_operands = 1 : i64, tpu.core_type = #tpu.core_type<tc>, window_params = [{transform_indices = @transform_0, window_bounds = array<i64: 1, 20, 64>}, {pipeline_mode = #tpu.pipeline_mode<synchronous>, transform_indices = @transform_1, window_bounds = array<i64: 3, 64, 128>}, {pipeline_mode = #tpu.pipeline_mode<synchronous>, transform_indices = @transform_2, window_bounds = array<i64: 1, 128>}, {pipeline_mode = #tpu.pipeline_mode<synchronous>, transform_indices = @transform_3, window_bounds = array<i64: 3, 128, 128>}, {pipeline_mode = #tpu.pipeline_mode<synchronous>, transform_indices = @transform_4, window_bounds = array<i64: 1, 128>}, {transform_indices = @transform_5, window_bounds = array<i64: 1, 16, 128>}]} {
    %cst = arith.constant 0.000000e+00 : bf16
    %0 = vector.broadcast %cst : bf16 to vector<2x128xbf16>
    %cst_0 = arith.constant 0.000000e+00 : f32
    %1 = vector.broadcast %cst_0 : f32 to vector<18x128xf32>
    %c0 = arith.constant 0 : index
    %c0_1 = arith.constant 0 : index
    %c0_2 = arith.constant 0 : index
    %2 = vector.load %arg1[%c0, %c0_1, %c0_2] : memref<1x20x64xbf16, #tpu.memory_space<vmem>>, vector<1x18x64xbf16>
    %3 = vector.shape_cast %2 : vector<1x18x64xbf16> to vector<18x64xbf16>
    %c0_3 = arith.constant 0 : index
    %c0_4 = arith.constant 0 : index
    %c0_5 = arith.constant 0 : index
    %4 = vector.load %arg2[%c0_3, %c0_4, %c0_5] : memref<3x64x128xbf16, #tpu.memory_space<vmem>>, vector<1x64x128xbf16>
    %5 = vector.shape_cast %4 : vector<1x64x128xbf16> to vector<64x128xbf16>
    %cst_6 = arith.constant dense<0.000000e+00> : vector<18x128xf32>
    %6 = tpu.matmul %3, %5, %cst_6 {dimension_numbers = #tpu.dot_dimension_numbers<[1], [0], [0], [1], [0, 0, 1, 1], [], []>} : vector<18x64xbf16>, vector<64x128xbf16>, vector<18x128xf32> -> vector<18x128xf32>
    %7 = arith.addf %1, %6 : vector<18x128xf32>
    %c0_7 = arith.constant 0 : index
    %c1 = arith.constant 1 : index
    %c0_8 = arith.constant 0 : index
    %8 = vector.load %arg1[%c0_7, %c1, %c0_8] : memref<1x20x64xbf16, #tpu.memory_space<vmem>>, vector<1x18x64xbf16>
    %9 = vector.shape_cast %8 : vector<1x18x64xbf16> to vector<18x64xbf16>
    %c1_9 = arith.constant 1 : index
    %c0_10 = arith.constant 0 : index
    %c0_11 = arith.constant 0 : index
    %10 = vector.load %arg2[%c1_9, %c0_10, %c0_11] : memref<3x64x128xbf16, #tpu.memory_space<vmem>>, vector<1x64x128xbf16>
    %11 = vector.shape_cast %10 : vector<1x64x128xbf16> to vector<64x128xbf16>
    %cst_12 = arith.constant dense<0.000000e+00> : vector<18x128xf32>
    %12 = tpu.matmul %9, %11, %cst_12 {dimension_numbers = #tpu.dot_dimension_numbers<[1], [0], [0], [1], [0, 0, 1, 1], [], []>} : vector<18x64xbf16>, vector<64x128xbf16>, vector<18x128xf32> -> vector<18x128xf32>
    %13 = arith.addf %7, %12 : vector<18x128xf32>
    %c0_13 = arith.constant 0 : index
    %c2 = arith.constant 2 : index
    %c0_14 = arith.constant 0 : index
    %14 = vector.load %arg1[%c0_13, %c2, %c0_14] : memref<1x20x64xbf16, #tpu.memory_space<vmem>>, vector<1x18x64xbf16>
    %15 = vector.shape_cast %14 : vector<1x18x64xbf16> to vector<18x64xbf16>
    %c2_15 = arith.constant 2 : index
    %c0_16 = arith.constant 0 : index
    %c0_17 = arith.constant 0 : index
    %16 = vector.load %arg2[%c2_15, %c0_16, %c0_17] : memref<3x64x128xbf16, #tpu.memory_space<vmem>>, vector<1x64x128xbf16>
    %17 = vector.shape_cast %16 : vector<1x64x128xbf16> to vector<64x128xbf16>
    %cst_18 = arith.constant dense<0.000000e+00> : vector<18x128xf32>
    %18 = tpu.matmul %15, %17, %cst_18 {dimension_numbers = #tpu.dot_dimension_numbers<[1], [0], [0], [1], [0, 0, 1, 1], [], []>} : vector<18x64xbf16>, vector<64x128xbf16>, vector<18x128xf32> -> vector<18x128xf32>
    %19 = arith.addf %13, %18 : vector<18x128xf32>
    %c0_19 = arith.constant 0 : index
    %c0_20 = arith.constant 0 : index
    %20 = vector.load %arg3[%c0_19, %c0_20] : memref<1x128xf32, #tpu.memory_space<vmem>>, vector<1x128xf32>
    %21 = vector.broadcast %20 : vector<1x128xf32> to vector<18x128xf32>
    %22 = arith.addf %19, %21 : vector<18x128xf32>
    %cst_21 = arith.constant 0.000000e+00 : f32
    %23 = vector.broadcast %cst_21 : f32 to vector<18x128xf32>
    %24 = arith.cmpf oge, %22, %23 : vector<18x128xf32>
    %cst_22 = arith.constant 0.00999999977 : f32
    %25 = vector.broadcast %cst_22 : f32 to vector<18x128xf32>
    %26 = arith.mulf %25, %22 : vector<18x128xf32>
    %27 = arith.select %24, %22, %26 : vector<18x128xi1>, vector<18x128xf32>
    %28 = arith.truncf %27 : vector<18x128xf32> to vector<18x128xbf16>
    %c8 = arith.constant 8 : index
    %c0_23 = arith.constant 0 : index
    %29 = vector.load %arg7[%c8, %c0_23] : memref<34x128xbf16, #tpu.memory_space<vmem>>, vector<18x128xbf16>
    tpu.vector_store %arg7[%c8, %c0_23], %28 {strides = array<i32>} : memref<34x128xbf16, #tpu.memory_space<vmem>>, vector<18x128xbf16>,
    %c7 = arith.constant 7 : index
    %c0_24 = arith.constant 0 : index
    %30 = vector.load %arg7[%c7, %c0_24] : memref<34x128xbf16, #tpu.memory_space<vmem>>, vector<2x128xbf16>
    tpu.vector_store %arg7[%c7, %c0_24], %0 {strides = array<i32>} : memref<34x128xbf16, #tpu.memory_space<vmem>>, vector<2x128xbf16>,
    %c25 = arith.constant 25 : index
    %c0_25 = arith.constant 0 : index
    %31 = vector.load %arg7[%c25, %c0_25] : memref<34x128xbf16, #tpu.memory_space<vmem>>, vector<2x128xbf16>
    tpu.vector_store %arg7[%c25, %c0_25], %0 {strides = array<i32>} : memref<34x128xbf16, #tpu.memory_space<vmem>>, vector<2x128xbf16>,
    %cst_26 = arith.constant 0.000000e+00 : f32
    %32 = vector.broadcast %cst_26 : f32 to vector<18x128xf32>
    %c7_27 = arith.constant 7 : index
    %c0_28 = arith.constant 0 : index
    %33 = vector.load %arg7[%c7_27, %c0_28] : memref<34x128xbf16, #tpu.memory_space<vmem>>, vector<18x128xbf16>
    %c0_29 = arith.constant 0 : index
    %c0_30 = arith.constant 0 : index
    %c0_31 = arith.constant 0 : index
    %34 = vector.load %arg4[%c0_29, %c0_30, %c0_31] : memref<3x128x128xbf16, #tpu.memory_space<vmem>>, vector<1x128x128xbf16>
    %35 = vector.shape_cast %34 : vector<1x128x128xbf16> to vector<128x128xbf16>
    %cst_32 = arith.constant dense<0.000000e+00> : vector<18x128xf32>
    %36 = tpu.matmul %33, %35, %cst_32 {dimension_numbers = #tpu.dot_dimension_numbers<[1], [0], [0], [1], [0, 0, 1, 1], [], []>} : vector<18x128xbf16>, vector<128x128xbf16>, vector<18x128xf32> -> vector<18x128xf32>
    %37 = arith.addf %32, %36 : vector<18x128xf32>
    %c8_33 = arith.constant 8 : index
    %c0_34 = arith.constant 0 : index
    %38 = vector.load %arg7[%c8_33, %c0_34] : memref<34x128xbf16, #tpu.memory_space<vmem>>, vector<18x128xbf16>
    %c1_35 = arith.constant 1 : index
    %c0_36 = arith.constant 0 : index
    %c0_37 = arith.constant 0 : index
    %39 = vector.load %arg4[%c1_35, %c0_36, %c0_37] : memref<3x128x128xbf16, #tpu.memory_space<vmem>>, vector<1x128x128xbf16>
    %40 = vector.shape_cast %39 : vector<1x128x128xbf16> to vector<128x128xbf16>
    %cst_38 = arith.constant dense<0.000000e+00> : vector<18x128xf32>
    %41 = tpu.matmul %38, %40, %cst_38 {dimension_numbers = #tpu.dot_dimension_numbers<[1], [0], [0], [1], [0, 0, 1, 1], [], []>} : vector<18x128xbf16>, vector<128x128xbf16>, vector<18x128xf32> -> vector<18x128xf32>
    %42 = arith.addf %37, %41 : vector<18x128xf32>
    %c9 = arith.constant 9 : index
    %c0_39 = arith.constant 0 : index
    %43 = vector.load %arg7[%c9, %c0_39] : memref<34x128xbf16, #tpu.memory_space<vmem>>, vector<18x128xbf16>
    %c2_40 = arith.constant 2 : index
    %c0_41 = arith.constant 0 : index
    %c0_42 = arith.constant 0 : index
    %44 = vector.load %arg4[%c2_40, %c0_41, %c0_42] : memref<3x128x128xbf16, #tpu.memory_space<vmem>>, vector<1x128x128xbf16>
    %45 = vector.shape_cast %44 : vector<1x128x128xbf16> to vector<128x128xbf16>
    %cst_43 = arith.constant dense<0.000000e+00> : vector<18x128xf32>
    %46 = tpu.matmul %43, %45, %cst_43 {dimension_numbers = #tpu.dot_dimension_numbers<[1], [0], [0], [1], [0, 0, 1, 1], [], []>} : vector<18x128xbf16>, vector<128x128xbf16>, vector<18x128xf32> -> vector<18x128xf32>
    %47 = arith.addf %42, %46 : vector<18x128xf32>
    %c0_44 = arith.constant 0 : index
    %c0_45 = arith.constant 0 : index
    %48 = vector.load %arg5[%c0_44, %c0_45] : memref<1x128xf32, #tpu.memory_space<vmem>>, vector<1x128xf32>
    %49 = vector.broadcast %48 : vector<1x128xf32> to vector<18x128xf32>
    %50 = arith.addf %47, %49 : vector<18x128xf32>
    %cst_46 = arith.constant 0.000000e+00 : f32
    %51 = vector.broadcast %cst_46 : f32 to vector<18x128xf32>
    %52 = arith.cmpf oge, %50, %51 : vector<18x128xf32>
    %cst_47 = arith.constant 0.00999999977 : f32
    %53 = vector.broadcast %cst_47 : f32 to vector<18x128xf32>
    %54 = arith.mulf %53, %50 : vector<18x128xf32>
    %55 = arith.select %52, %50, %54 : vector<18x128xi1>, vector<18x128xf32>
    %56 = vector.extract_strided_slice %55 {offsets = [1, 0], sizes = [16, 128], strides = [1, 1]} : vector<18x128xf32> to vector<16x128xf32>
    %c0_48 = arith.constant 0 : index
    %c0_49 = arith.constant 0 : index
    %c0_50 = arith.constant 0 : index
    %57 = vector.load %arg6[%c0_48, %c0_49, %c0_50] : memref<1x16x128xf32, #tpu.memory_space<vmem>>, vector<1x16x128xf32>
    %58 = vector.shape_cast %57 : vector<1x16x128xf32> to vector<16x128xf32>
    %59 = vector.shape_cast %56 : vector<16x128xf32> to vector<1x16x128xf32>
    tpu.vector_store %arg6[%c0_48, %c0_49, %c0_50], %59 {strides = array<i32>} : memref<1x16x128xf32, #tpu.memory_space<vmem>>, vector<1x16x128xf32>,
    return
  }
  func.func @transform_0(%arg0: i32) -> (i32, i32, i32) {
    %c0_i32 = arith.constant 0 : i32
    %c0_i32_0 = arith.constant 0 : i32
    %c0_i32_1 = arith.constant 0 : i32
    return %arg0, %c0_i32, %c0_i32_0 : i32, i32, i32
  }
  func.func @transform_1(%arg0: i32) -> (i32, i32, i32) {
    %c0_i32 = arith.constant 0 : i32
    %c0_i32_0 = arith.constant 0 : i32
    %c0_i32_1 = arith.constant 0 : i32
    %c0_i32_2 = arith.constant 0 : i32
    return %c0_i32, %c0_i32_0, %c0_i32_1 : i32, i32, i32
  }
  func.func @transform_2(%arg0: i32) -> (i32, i32) {
    %c0_i32 = arith.constant 0 : i32
    %c0_i32_0 = arith.constant 0 : i32
    %c0_i32_1 = arith.constant 0 : i32
    return %c0_i32, %c0_i32_0 : i32, i32
  }
  func.func @transform_3(%arg0: i32) -> (i32, i32, i32) {
    %c0_i32 = arith.constant 0 : i32
    %c0_i32_0 = arith.constant 0 : i32
    %c0_i32_1 = arith.constant 0 : i32
    %c0_i32_2 = arith.constant 0 : i32
    return %c0_i32, %c0_i32_0, %c0_i32_1 : i32, i32, i32
  }
  func.func @transform_4(%arg0: i32) -> (i32, i32) {
    %c0_i32 = arith.constant 0 : i32
    %c0_i32_0 = arith.constant 0 : i32
    %c0_i32_1 = arith.constant 0 : i32
    return %c0_i32, %c0_i32_0 : i32, i32
  }
  func.func @transform_5(%arg0: i32) -> (i32, i32, i32) {
    %c0_i32 = arith.constant 0 : i32
    %c0_i32_0 = arith.constant 0 : i32
    %c0_i32_1 = arith.constant 0 : i32
    return %arg0, %c0_i32, %c0_i32_0 : i32, i32, i32
  }
}

</mosaic_0001>

<bundles_post_ra>
// kernel: block_forward.1
= control target key start
LH: loop header
LB: loop body
LE: loop exit
PB: predicated region body
PF: predicated region fallthrough
CT: control target
= control target key end

     0   :  { %s1176_s18 = smov 0   ;;  %s1320_s0 = inlined_call_operand.vmem [shape: bf16[2,20,64], index: 0, kind: input, shape index: {}]   ;;  %s1321_s1 = inlined_call_operand.vmem [shape: bf16[3,64,128], index: 1, kind: input, shape index: {}]   ;;  %s1322_s2 = inlined_call_operand.vmem [shape: f32[1,128], index: 2, kind: input, shape index: {}]   ;;  %s1323_s3 = inlined_call_operand.vmem [shape: bf16[3,128,128], index: 3, kind: input, shape index: {}]   ;;  %s1324_s4 = inlined_call_operand.vmem [shape: f32[1,128], index: 4, kind: input, shape index: {}]   ;;  %s1325_s5 = inlined_call_operand.vmem [shape: f32[2,16,128], index: 5, kind: output, shape index: {}]  }
   0x1 LB: > { %s862_s19 = sadd.s32 4294967295, %s1144_s18   ;;  %p866_p0 = scmp.ge.s32.totalorder %s1144_s18, 1  ;;  %s1144_s18 = sphi %s1176_s18, %s15_s18  }
   0x2   : > { %p187_p1 = scmp.lt.s32.totalorder %s1144_s18, 3 }
   0x4   : > { %p188_p2 = pnand %p866_p0, %p187_p1 }
   0x5   : > { %p215_p3 = scmp.lt.s32.totalorder (!%p188_p2), %s862_s19, 1 }
   0x6   : > { %191 = sbr.rel (%p188_p2) target bundleno = 363 (0x16b), region = 40 }
   0xb   : > { %v1078_v0 = vld [vmem:[%s1321_s1 + $0x38] sm:$0xff]  ;;  %v1077_v3 = vld [vmem:[%s1321_s1 + $0x30] sm:$0xff]  ;;  %s1327_s19 = smov (!%p215_p3, %s862_s19), 1  ;;  %v1076_v6 = vld [vmem:[%s1321_s1 + $0x28] sm:$0xff]  ;;  %vm383_vm0 = vcmask 1046528   ;;  %vm295_vm2 = vcmask 523264  }
   0xc   : > { %v1074_v1 = vld [vmem:[%s1321_s1 + $0x18] sm:$0xff]  ;;  %306 = vmatpush.bf16.msra.mxu0 %v1078_v0  ;;  %v1073_v4 = vld [vmem:[%s1321_s1 + $0x10] sm:$0xff]  ;;  %s1122_s7 = smul.u32 12, %s1327_s19  ;;  %v1072_v7 = vld [vmem:[%s1321_s1 + $0x8] sm:$0xff]  ;;  %vm255_vm1 = vsmask.f32 7424 }
   0xd   : > { %v1082_v2 = vld [vmem:[%s1321_s1 + $0x58] sm:$0xff]  ;;  %356 = vmatpush.bf16.msra.mxu1 %v1074_v1  ;;  %v1081_v5 = vld [vmem:[%s1321_s1 + $0x50] sm:$0xff]  ;;  %v1080_v8 = vld [vmem:[%s1321_s1 + $0x48] sm:$0xff]  ;;  %vm460_vm3 = vcmask 1043459   ;;  %vm461_vm4 = vsmask.f32 7950 }
   0xe   : > { %421 = vmatpush.bf16.msra.mxu2 %v1082_v2  ;;  %s1217_s16 = scalar_lea.vmem %s1320_s0, %s1122_s7  ;;  %v1075_v17 = vld [vmem:[%s1321_s1 + $0x20] sm:$0xff]  ;;  %v1098_v34 = vld [vmem:[%s1323_s3 + $0x78] sm:$0xff]  ;;  %v1097_v35 = vld [vmem:[%s1323_s3 + $0x70] sm:$0xff]  ;;  %vm466_vm7 = vcmask 1040384   ;;  %vm467_vm8 = vsmask.f32 256 }
   0xf   : > { %v1108_v9 = vld [vmem:[%s1217_s16] sm:$0xff]   ;;  %v237_v10 = vld [vmem:[%s1217_s16 + $0x8] sm:$0x3]  ;;  %573 = vmatpush.bf16.msra.mxu3 %v1098_v34  ;;  %v1094_v38 = vld [vmem:[%s1323_s3 + $0x58] sm:$0xff]  ;;  %vm472_vm12 = vcmask 1041408   ;;  %s1070_s6 = sshll.u32 %s1327_s19, 4 }
  0x10   : > { %307 = vmatpush.bf16.msra.mxu0 %v1077_v3  ;;  %v1111_v11 = vld [vmem:[%s1217_s16] sm:$0xf0]  ;;  %v252_v12 = vunpack.c.l.b16 %v237_v10  ;;  %v257_v13 = vshrl.u32 %v1108_v9, 16  ;;  %v259_v14 = vshll.u32 %v1108_v9, 16  ;;  %v1112_v15 = vld [vmem:[%s1217_s16] sm:$0xe]  ;;  %vm462_vm5 = vmand %vm460_vm3, %vm461_vm4  ;;  %s224_s9 = scalar_lea.vmem %s1325_s5, %s1070_s6 }
  0x11   : > { %357 = vmatpush.bf16.msra.mxu1 %v1073_v4  ;;  %v1113_v16 = vor.u32 %v1112_v15, %v1111_v11  ;;  %v1071_v18 = vld [vmem:[%s1321_s1] sm:$0xff]  ;;  %v228_v29 = vld [vmem:[%s1217_s16 + $0x8] sm:$0x1]  ;;  %v1093_v40 = vld [vmem:[%s1323_s3 + $0x50] sm:$0xff]  ;;  %vm473_vm13 = vsmask.f32 1282 }
  0x12   : > { %422 = vmatpush.bf16.msra.mxu2 %v1081_v5  ;;  %v254_v19 = vpack.c.b16 %v252_v12, %v252_v12  ;;  %v261_v20 = vrot.slane %v259_v14, 1  ;;  %v1079_v21 = vld [vmem:[%s1321_s1 + $0x40] sm:$0xff]  ;;  %v321_v31 = vunpack.c.l.b16 %v228_v29  ;;  %v1096_v36 = vld [vmem:[%s1323_s3 + $0x68] sm:$0xff]  ;;  %v1106_v42 = vld [vmem:[%s1323_s3 + $0xb8] sm:$0xff]  ;;  %vm595_vm15 = vsmask.f32 4352 }
  0x13   : > { %v384_v22 = vrot.slane %v1113_v16, 1  ;;  %574 = vmatpush.bf16.msra.mxu3 %v1097_v35  ;;  %v1095_v37 = vld [vmem:[%s1323_s3 + $0x60] sm:$0xff]  ;;  %v1090_v43 = vld [vmem:[%s1323_s3 + $0x38] sm:$0xff]  ;;  %v1092_v44 = vld [vmem:[%s1323_s3 + $0x48] sm:$0xff] }
  0x14   : > { %308 = vmatpush.bf16.msra.mxu0 %v1076_v6  ;;  %v262_v23 = vor.u32 %v261_v20, %v257_v13  ;;  %v264_v24 = vshll.u32 %v254_v19, 16  ;;  %v385_v25 = vrot.slane %v254_v19, 1  ;;  %v268_v30 = vshrl.u32 %v254_v19, 16  ;;  %v463_v39 = vld [vmem:[#allocation2] sm:$0x8]  ;;  %v1105_v45 = vld [vmem:[%s1323_s3 + $0xb0] sm:$0xff]  ;;  %vm468_vm10 = vmand %vm466_vm7, %vm467_vm8 }
  0x15   : > { %358 = vmatpush.bf16.msra.mxu1 %v1072_v7  ;;  %v322_v33 = vpack.c.b16 %v321_v31, %v321_v31  ;;  %v464_v41 = vsel %vm462_vm5, 0, %v463_v39  ;;  %v1089_v46 = vld [vmem:[%s1323_s3 + $0x30] sm:$0xff]  ;;  %v1091_v49 = vld [vmem:[%s1323_s3 + $0x40] sm:$0xff]  ;;  %v1104_v50 = vld [vmem:[%s1323_s3 + $0xa8] sm:$0xff] }
  0x16   : > { %423 = vmatpush.bf16.msra.mxu2 %v1080_v8  ;;  %v266_v26 = vrot.slane %v264_v24, 1  ;;  %v386_v27 = vsel %vm383_vm0, %v384_v22, %v385_v25  ;;  %465 = vst [vmem:[#allocation2] sm:$0x8] %v464_v41  ;;  %v1088_v51 = vld [vmem:[%s1323_s3 + $0x28] sm:$0xff]  ;;  %v1131_v53 = vld [vmem:[%s1322_s2] ss:$0 sm:$0xff]  ;;  %vm474_vm14 = vmand %vm472_vm12, %vm473_vm13 }
  0x17   : > { %575 = vmatpush.bf16.msra.mxu3 %v1096_v36  ;;  %v1103_v54 = vld [vmem:[%s1323_s3 + $0xa0] sm:$0xff]  ;;  %v1102_v61 = vld [vmem:[%s1323_s3 + $0x98] sm:$0xff]  ;;  %v1101_v0 = vld [vmem:[%s1323_s3 + $0x90] sm:$0xff] }
  0x18   : > { %309 = vmatpush.bf16.msra.mxu0 %v1075_v17  ;;  %v267_v28 = vsel %vm255_vm1, %v262_v23, %v266_v26  ;;  %v270_v32 = vor.u32 %v268_v30, %v266_v26  ;;  %v1087_v56 = vld [vmem:[%s1323_s3 + $0x20] sm:$0xff]  ;;  %v1086_v62 = vld [vmem:[%s1323_s3 + $0x18] sm:$0xff]  ;;  %v1085_v1 = vld [vmem:[%s1323_s3 + $0x10] sm:$0xff] }
  0x19   : > { %359 = vmatpush.bf16.msra.mxu1 %v1071_v18  ;;  %v1084_v10 = vld [vmem:[%s1323_s3 + $0x8] sm:$0xff]  ;;  %v1099_v15 = vld [vmem:[%s1323_s3 + $0x80] sm:$0xff] }
  0x1a   : > { %424 = vmatpush.bf16.msra.mxu2 %v1079_v21  ;;  %v1083_v16 = vld [vmem:[%s1323_s3] sm:$0xff] }
  0x1b   : > { %894 = vmatmul.msk.bf16.vlgmr.msra.gmra.mxu0 %vm295_vm2, %v267_v28  ;;  %576 = vmatpush.bf16.msra.mxu3 %v1095_v37 }
  0x1c   : > { %912 = vmatmul.msk.bf16.vlgmr.msra.gmra.mxu1 %vm295_vm2, %v1108_v9  ;;  %663 = vmatpush.bf16.msrb.mxu0 %v1090_v43  ;;  %v1100_v9 = vld [vmem:[%s1323_s3 + $0x88] sm:$0xff] }
  0x1d   : > { %938 = vmatmul.msk.bf16.vlgmr.msra.gmra.mxu2 %vm295_vm2, %v386_v27  ;;  %767 = vmatpush.bf16.msrb.mxu1 %v1106_v42 }
  0x1e   : > { %1114 = vmatpush.bf16.msrb.mxu2 %v1090_v43 }
  0x1f   : > { %577 = vmatpush.bf16.msra.mxu3 %v1094_v38 }
  0x20   : > { %664 = vmatpush.bf16.msrb.mxu0 %v1089_v46 }
  0x21   : > { %768 = vmatpush.bf16.msrb.mxu1 %v1105_v45 }
  0x22   : > { %1115 = vmatpush.bf16.msrb.mxu2 %v1089_v46 }
  0x23   : > { %578 = vmatpush.bf16.msra.mxu3 %v1093_v40 }
  0x24   : > { %665 = vmatpush.bf16.msrb.mxu0 %v1088_v51 }
  0x25   : > { %769 = vmatpush.bf16.msrb.mxu1 %v1104_v50 }
  0x26   : > { %1116 = vmatpush.bf16.msrb.mxu2 %v1088_v51 }
  0x27   : > { %579 = vmatpush.bf16.msra.mxu3 %v1092_v44 }
  0x28   : > { %666 = vmatpush.bf16.msrb.mxu0 %v1087_v56 }
  0x29   : > { %770 = vmatpush.bf16.msrb.mxu1 %v1103_v54 }
  0x2a   : > { %1117 = vmatpush.bf16.msrb.mxu2 %v1087_v56 }
  0x2b   : > { %895 = vmatmul.msk.bf16.gmra.mxu0 %vm295_vm2, %v270_v32  ;;  %580 = vmatpush.bf16.msra.mxu3 %v1091_v49  ;;  %v1135_v32 = vld [vmem:[#allocation2] sm:$0x8] }
  0x2c   : > { %913 = vmatmul.msk.bf16.gmra.mxu1 %vm295_vm2, %v322_v33  ;;  %667 = vmatpush.bf16.msrb.mxu0 %v1086_v62 }
  0x2d   : > { %939 = vmatmul.msk.bf16.gmra.mxu2 %vm295_vm2, %v385_v25  ;;  %771 = vmatpush.bf16.msrb.mxu1 %v1102_v61 }
  0x2e   : > { %1118 = vmatpush.bf16.msrb.mxu2 %v1086_v62 }
  0x30   : > { %668 = vmatpush.bf16.msrb.mxu0 %v1085_v1 }
  0x31   : > { %772 = vmatpush.bf16.msrb.mxu1 %v1101_v0 }
  0x32   : > { %1119 = vmatpush.bf16.msrb.mxu2 %v1085_v1 }
  0x34   : > { %669 = vmatpush.bf16.msrb.mxu0 %v1084_v10 }
  0x35   : > { %773 = vmatpush.bf16.msrb.mxu1 %v1100_v9 }
  0x36   : > { %1120 = vmatpush.bf16.msrb.mxu2 %v1084_v10 }
  0x38   : > { %670 = vmatpush.bf16.msrb.mxu0 %v1083_v16 }
  0x39   : > { %774 = vmatpush.bf16.msrb.mxu1 %v1099_v15 }
  0x3a   : > { %1121 = vmatpush.bf16.msrb.mxu2 %v1083_v16 }
  0x98   : > { %v311_v47 = vpop.f32.mrf.mxu0 }
  0x99   : > { %v361_v48 = vpop.f32.mrf.mxu1 }
  0x9a   : > { %v362_v52 = vadd.f32 %v361_v48, %v311_v47 }
  0xa0   : > { %v426_v55 = vpop.f32.mrf.mxu2  ;;  %v313_v58 = vpop.f32.mrf.mxu0 }
  0xa1   : > { %v435_v57 = vadd.f32 %v426_v55, %v362_v52  ;;  %v363_v59 = vpop.f32.mrf.mxu1 }
  0xa2   : > { %v364_v3 = vadd.f32 %v363_v59, %v313_v58 }
  0xa3   : > { %v442_v60 = vadd.f32 %v1131_v53, %v435_v57 }
  0xa5   : > { %vm445_vm6 = vcmp.ge.f32.partialorder %v442_v60, 0.0  ;;  %v448_v63 = vmul.f32 0.01, %v442_v60 }
  0xa7   : > { %v451_v2 = vsel %vm445_vm6, %v442_v60, %v448_v63 }
  0xa8   : > { %v454_v4 = vpack.c.bf16 %v451_v2, %v451_v2  ;;  %v428_v5 = vpop.f32.mrf.mxu2  ;;  %v316_v7 = vpop.f32.mrf.mxu0 }
  0xa9   : > { %v436_v6 = vadd.f32 %v428_v5, %v364_v3  ;;  %v366_v8 = vpop.f32.mrf.mxu1  ;;  %v1132_v5 = vld [vmem:[%s1324_s4] ss:$0 sm:$0xff] }
  0xaa   : > { %457 = vst [vmem:[#allocation2 + $0x4] sm:$0xf] %v454_v4  ;;  %v367_v13 = vadd.f32 %v366_v8, %v316_v7 }
  0xab   : > { %v443_v11 = vadd.f32 %v1131_v53, %v436_v6 }
  0xad   : > { %vm446_vm9 = vcmp.ge.f32.partialorder %v443_v11, 0.0  ;;  %v449_v12 = vmul.f32 0.01, %v443_v11 }
  0xaf   : > { %v452_v14 = vsel %vm446_vm9, %v443_v11, %v449_v12 }
  0xb0   : > { %v455_v17 = vpack.c.bf16 %v452_v14, %v452_v14  ;;  %v431_v18 = vpop.f32.mrf.mxu2  ;;  %v318_v21 = vpop.f32.mrf.mxu0 }
  0xb1   : > { %v469_v19 = vld [vmem:[#allocation2 + $0x4] sm:$0x1]  ;;  %v437_v20 = vadd.f32 %v431_v18, %v367_v13  ;;  %v368_v22 = vpop.f32.mrf.mxu1 }
  0xb2   : > { %v470_v23 = vsel %vm468_vm10, 0, %v469_v19  ;;  %458 = vst [vmem:[#allocation2 + $0x8] sm:$0xf] %v455_v17 }
  0xb3   : > { %471 = vst [vmem:[#allocation2 + $0x4] sm:$0x1] %v470_v23  ;;  %v444_v24 = vadd.f32 %v1131_v53, %v437_v20 }
  0xb5   : > { %vm447_vm11 = vcmp.ge.f32.partialorder %v444_v24, 0.0  ;;  %v450_v25 = vmul.f32 0.01, %v444_v24 }
  0xb7   : > { %v453_v26 = vsel %vm447_vm11, %v444_v24, %v450_v25 }
  0xb8   : > { %v456_v27 = vpack.c.bf16 %v453_v26, %v453_v26  ;;  %v433_v28 = vpop.f32.mrf.mxu2 }
  0xba   : > { %459 = vst [vmem:[#allocation2 + $0xc] sm:$0x1] %v456_v27  ;;  %v479_v29 = vld [vmem:[#allocation2 + $0x4] sm:$0xff]  }
  0xbb   : > { %v1141_v30 = vld [vmem:[#allocation2] sm:$0xf0]   ;;  %v519_v31 = vunpack.c.h.b16 %v479_v29  ;;  %581 = vmatmul.bf16.vlgmr.msra.gmra.mxu3 %v479_v29  ;;  %v705_v36 = vshll.u32 %v479_v29, 16  ;;  %v703_v47 = vshrl.u32 %v479_v29, 16 }
  0xbc   : > { %v1136_v35 = vor.u32 %v1141_v30, %v1135_v32 }
  0xbd   : > { %v707_v46 = vrot.slane %v705_v36, 1 }
  0xbe   : > { %v597_v39 = vshrl.u32 %v1136_v35, 16  ;;  %v600_v42 = vshll.u32 %v1136_v35, 16 }
  0xbf   : > { %v708_v53 = vor.u32 %v707_v46, %v703_v47 }
  0xc0   : > { %v599_v48 = vrot.slane %v597_v39, 3  ;;  %v602_v52 = vrot.slane %v600_v42, 4 }
  0xc1   : > { %v475_v33 = vld [vmem:[#allocation2 + $0xc] sm:$0x3] }
  0xc2   : > { %v476_v34 = vsel %vm474_vm14, 0, %v475_v33  ;;  %v603_v59 = vor.u32 %v602_v52, %v599_v48 }
  0xc3   : > { %477 = vst [vmem:[#allocation2 + $0xc] sm:$0x3] %v476_v34 }
  0xca   : > { %v481_v37 = vld [vmem:[#allocation2 + $0xc] sm:$0x1] }
  0xcb   : > { %v681_v38 = vld [vmem:[#allocation2 + $0xc] sm:$0x3]  ;;  %v520_v40 = vunpack.c.l.b16 %v481_v37 }
  0xcc   : > { %v700_v41 = vunpack.c.l.b16 %v681_v38 }
  0xcd   : > { %v522_v43 = vpack.c.b16 %v520_v40, %v520_v40  ;;  %v594_v44 = vpack.c.b16 %v520_v40, %v519_v31 }
  0xce   : > { %v701_v45 = vpack.c.b16 %v700_v41, %v700_v41 }
  0xcf   : > { %586 = vmatmul.bf16.gmra.mxu3 %v522_v43  ;;  %v605_v50 = vshrl.u32 %v594_v44, 16  ;;  %v608_v51 = vshll.u32 %v594_v44, 16 }
  0xd0   : > { %v710_v49 = vshll.u32 %v701_v45, 16  ;;  %v714_v61 = vshrl.u32 %v701_v45, 16 }
  0xd1   : > { %v607_v55 = vrot.slane %v605_v50, 3  ;;  %v610_v56 = vrot.slane %v608_v51, 4 }
  0xd2   : > { %v712_v54 = vrot.slane %v710_v49, 1 }
  0xd3   : > { %v611_v58 = vor.u32 %v610_v56, %v607_v55 }
  0xd4   : > { %v713_v57 = vsel %vm255_vm1, %v708_v53, %v712_v54  ;;  %v716_v62 = vor.u32 %v714_v61, %v712_v54 }
  0xd5   : > { %775 = vmatmul.bf16.vlgmr.msrb.gmra.mxu1 %v713_v57  ;;  %676 = vmatmul.bf16.vlgmr.msrb.gmra.mxu2 %v611_v58  ;;  %v612_v60 = vsel %vm595_vm15, %v603_v59, %v611_v58 }
  0xd6   : > { %671 = vmatmul.bf16.vlgmr.msrb.gmra.mxu0 %v612_v60 }
  0xe5   : > { %780 = vmatmul.bf16.gmra.mxu1 %v716_v62 }
 0x13e   : > { %v582_v63 = vpop.f32.mrf.mxu3 }
 0x146   : > { %v584_v0 = vpop.f32.mrf.mxu3 }
 0x152   : > { %v776_v1 = vpop.f32.mrf.mxu1  ;;  %v587_v2 = vpop.f32.mrf.mxu3 }
 0x153   : > { %v672_v3 = vpop.f32.mrf.mxu0 }
 0x154   : > { %v673_v4 = vadd.f32 %v672_v3, %v582_v63 }
 0x156   : > { %v785_v6 = vadd.f32 %v776_v1, %v673_v4 }
 0x158   : > { %v792_v7 = vadd.f32 %v1132_v5, %v785_v6  ;;  %v677_v8 = vpop.f32.mrf.mxu2 }
 0x159   : > { %v678_v16 = vadd.f32 %v677_v8, %v587_v2 }
 0x15a   : > { %v778_v9 = vpop.f32.mrf.mxu1  ;;  %vm795_vm0 = vcmp.ge.f32.partialorder %v792_v7, 0.0  ;;  %v798_v10 = vmul.f32 0.01, %v792_v7  ;;  %v589_v11 = vpop.f32.mrf.mxu3 }
 0x15b   : > { %v674_v12 = vpop.f32.mrf.mxu0 }
 0x15c   : > { %v801_v13 = vsel %vm795_vm0, %v792_v7, %v798_v10  ;;  %v675_v14 = vadd.f32 %v674_v12, %v584_v0 }
 0x15d   : > { %804 = vst [vmem:[%s224_s9 - $0x1] sm:$0xfe] %v801_v13 }
 0x15e   : > { %v786_v15 = vadd.f32 %v778_v9, %v675_v14 }
 0x160   : > { %v793_v17 = vadd.f32 %v1132_v5, %v786_v15  ;;  %v679_v18 = vpop.f32.mrf.mxu2 }
 0x162   : > { %v781_v19 = vpop.f32.mrf.mxu1  ;;  %vm796_vm1 = vcmp.ge.f32.partialorder %v793_v17, 0.0  ;;  %v799_v20 = vmul.f32 0.01, %v793_v17 }
 0x163   : > { %v787_v21 = vadd.f32 %v781_v19, %v678_v16 }
 0x164   : > { %v802_v22 = vsel %vm796_vm1, %v793_v17, %v799_v20 }
 0x165   : > { %v794_v23 = vadd.f32 %v1132_v5, %v787_v21  ;;  %805 = vst [vmem:[%s224_s9 + $0x7] sm:$0xff] %v802_v22 }
 0x167   : > { %vm797_vm2 = vcmp.ge.f32.partialorder %v794_v23, 0.0  ;;  %v800_v24 = vmul.f32 0.01, %v794_v23 }
 0x169   : > { %v803_v25 = vsel %vm797_vm2, %v794_v23, %v800_v24 }
 0x16a   : > { %806 = vst [vmem:[%s224_s9 + $0xf] sm:$0x1] %v803_v25  ;;  %v783_v26 = vpop.f32.mrf.mxu1 }
 0x16b PF: > { %s15_s18 = sadd.s32 1, %s1144_s18  }
 0x16c   : > { %p12_p4 = scmp.ge.s32.totalorder %s15_s18, 4  }
 0x16e   :  { %14 = sbr.rel (!%p12_p4) target bundleno = 1 (0x1), region = 74 }

</bundles_post_ra>
